<compile_context>
chip_gen: v6e
topology: v6e:2x2x1
jax: 0.10.0
libtpu: 0.0.40
codegen_flags: <defaults>
</compile_context>

<pallas_src>
from functools import partial

import numpy as np
import jax
import jax.numpy as jnp
from jax import lax
from jax.experimental import pallas as pl
from jax.experimental.pallas import tpu as pltpu


def _spin_decoder_kernel(xf_ref, etaf_ref, etawf_ref, out_ref, *, mxu_dtype):
    # xf_ref:    (Bb, N, P) block of the fused-x operand, P = M*K
    # etaf_ref:  (N, P)   eta_f[i, m*K+k]  = eta[i, k]            (grid-invariant)
    # etawf_ref: (N, P)   etaw_f[j, m*K+k] = eta[j, k]*wnu[m, k]  (grid-invariant)
    # out_ref:   (Bb, N, N)
    xf = xf_ref[...]                       # (Bb, N, P) float32
    eta_f = etaf_ref[...]                  # (N, P)
    etaw_f = etawf_ref[...]                # (N, P)

    # Fused MXU operands (optional bf16 cast at the MXU inputs only; f32 acc).
    A = (xf * eta_f[None, :, :]).astype(mxu_dtype)     # (Bb, N, P)
    Bm = (xf * etaw_f[None, :, :]).astype(mxu_dtype)   # (Bb, N, P)

    # Single batched MXU contraction over the fused P = M*K axis.
    J = jnp.einsum('bip,bjp->bij', A, Bm,
                   preferred_element_type=jnp.float32)  # (Bb, N, N)

    # Strict upper-triangular mask (i < j).
    n = J.shape[-1]
    row = lax.broadcasted_iota(jnp.int32, (n, n), 0)
    col = lax.broadcasted_iota(jnp.int32, (n, n), 1)
    mask = (col > row)[None, :, :]
    Jm = jnp.where(mask, J, 0.0)

    # ||triu_vec(J)||_2 == Frobenius norm of the masked matrix, per batch elem.
    ss = jnp.sum(Jm * Jm, axis=(1, 2), keepdims=True)   # (Bb, 1, 1)
    # Matches reference / PyTorch semantics: an all-zero J yields inf/NaN
    # (no epsilon guard), exactly like the torch.norm division.
    out_ref[...] = (Jm * lax.rsqrt(ss)).astype(out_ref.dtype)


def _pick_block_b(B: int) -> int:
    # Block several batch elements per grid step (bigger DMAs, amortized
    # per-step overhead) while keeping >= 2 grid steps so the "parallel"
    # batch axis can shard across v7x's two TensorCores. Always divides B.
    for cand in (64, 32, 16, 8, 4, 2):
        if B % cand == 0 and B // cand >= 2:
            return cand
    return 1


@partial(jax.jit, static_argnames=("use_bf16_matmul",))
def spin_decoder_forward(x, eta, w_mult_nu, *, use_bf16_matmul=False):
    """x: (B, N, M) f32; eta: (N, 3N); w_mult_nu: (M, 3N).
    Returns (B, N*(N-1)//2) f32 — normalized strict-upper-triangle of J."""
    B, N, M = x.shape
    K = eta.shape[1]
    P = M * K
    Bb = _pick_block_b(B)

    # ---- constant pre-fusion (wrapper-side, analogous to torch __init__) ----
    # eta_f[i, m*K+k]  = eta[i, k]
    eta_f = jnp.tile(eta, (1, M)).astype(jnp.float32)                      # (N, P)
    # etaw_f[j, m*K+k] = eta[j, k] * w_mult_nu[m, k]
    etaw_f = jnp.transpose(w_mult_nu[:, None, :] * eta[None, :, :],
                           (1, 0, 2)).reshape(N, P).astype(jnp.float32)    # (N, P)

    # ---- x layout plumbing: fused lane-dense operand (p = m*K + k) ----------
    # TODO(synk): at large K this K-fold input expansion could be done
    # in-kernel (broadcast + minor-dims reshape) to save HBM input bandwidth;
    # kept in the wrapper for lowering robustness at these shapes.
    x_f = jnp.broadcast_to(x[:, :, :, None], (B, N, M, K)).reshape(B, N, P)
    x_f = x_f.astype(jnp.float32)

    mxu_dtype = jnp.bfloat16 if use_bf16_matmul else jnp.float32

    J_norm = pl.pallas_call(
        partial(_spin_decoder_kernel, mxu_dtype=mxu_dtype),
        out_shape=jax.ShapeDtypeStruct((B, N, N), jnp.float32),
        grid_spec=pltpu.PrefetchScalarGridSpec(
            num_scalar_prefetch=0,
            grid=(B // Bb,),
            in_specs=[
                pl.BlockSpec((Bb, N, P), lambda b: (b, 0, 0)),
                pl.BlockSpec((N, P), lambda b: (0, 0)),   # grid-invariant const
                pl.BlockSpec((N, P), lambda b: (0, 0)),   # grid-invariant const
            ],
            out_specs=pl.BlockSpec((Bb, N, N), lambda b: (b, 0, 0)),
        ),
        compiler_params=pltpu.CompilerParams(
            dimension_semantics=("parallel",),
        ),
    )(x_f, eta_f, etaw_f)

    # Glue: extract the strict upper triangle (row-major, same order as torch
    # boolean-mask indexing). Normalization already applied in-kernel.
    # TODO(synk): a packed lane-dense triu output block would avoid masked vst
    # stores for small N, but needs an in-kernel minor-dims reshape; skipped
    # for lowering robustness.
    iu, ju = np.triu_indices(N, k=1)
    return J_norm[:, iu, ju]


def reference_forward(x, eta, w_mult_nu):
    """Pure-JAX reference mirroring the PyTorch module."""
    y = jnp.einsum('bim,in->bimn', x, eta)
    y = jnp.einsum('bimn,bjmn->bij', y, y * w_mult_nu[None, None, :, :])
    N = x.shape[1]
    iu, ju = np.triu_indices(N, k=1)
    v = y[:, iu, ju]
    return v / jnp.linalg.norm(v, axis=-1, keepdims=True)


if __name__ == "__main__":
    # --- synthetic, deterministic "physical" system (normalized units) ------
    B, N, M = 2, 4, 8            # batch, ions, drive tones
    K = 3 * N                    # number of normal modes

    key = jax.random.PRNGKey(0)
    k_b, k_w, k_mu, k_x = jax.random.split(key, 4)

    hbar = jnp.float32(1.0)
    m_ion = jnp.float32(1.0)
    deltak = jnp.array([1.0, 0.0, 0.0], dtype=jnp.float32)

    b_mat = jax.random.normal(k_b, (3, N, K), dtype=jnp.float32)          # mode matrix
    w = jax.random.uniform(k_w, (K,), dtype=jnp.float32, minval=1.0, maxval=2.0)
    mu = jax.random.uniform(k_mu, (M,), dtype=jnp.float32, minval=2.5, maxval=3.5)

    # eta_{i,n} = sum_k b_{k,i,n} * deltak_k * sqrt(hbar / (2 m w_n))
    eta = jnp.einsum('kim,k,m->im', b_mat, deltak,
                     jnp.sqrt(hbar / (2.0 * m_ion * w))).astype(jnp.float32)
    nu = 1.0 / (mu[:, None] ** 2 - w[None, :] ** 2)                        # (M, K)
    w_mult_nu = (w[None, :] * nu).astype(jnp.float32)                      # (M, K)

    x = jax.random.normal(k_x, (B, N, M), dtype=jnp.float32)

    # --- run kernel & check against pure-JAX reference ----------------------
    out = spin_decoder_forward(x, eta, w_mult_nu)
    out = jax.block_until_ready(out)

    ref = jax.block_until_ready(reference_forward(x, eta, w_mult_nu))
    np.testing.assert_allclose(np.asarray(out), np.asarray(ref),
                               rtol=1e-4, atol=1e-5)

    print("KERNEL_OK")
</pallas_src>

<mosaic_0001>
module attributes {stable_mosaic.version = 11 : i64} {
  func.func @_spin_decoder_kernel(%arg0: i32, %arg1: memref<1x4x96xf32, #tpu.memory_space<vmem>>, %arg2: memref<4x96xf32, #tpu.memory_space<vmem>>, %arg3: memref<4x96xf32, #tpu.memory_space<vmem>>, %arg4: memref<1x4x4xf32, #tpu.memory_space<vmem>>) attributes {dimension_semantics = [#tpu.dimension_semantics<parallel>], iteration_bounds = array<i64: 2>, scalar_prefetch = 0 : i64, scratch_operands = 0 : i64, tpu.core_type = #tpu.core_type<tc>, window_params = [{transform_indices = @transform_0, window_bounds = array<i64: 1, 4, 96>}, {pipeline_mode = #tpu.pipeline_mode<synchronous>, transform_indices = @transform_1, window_bounds = array<i64: 4, 96>}, {pipeline_mode = #tpu.pipeline_mode<synchronous>, transform_indices = @transform_2, window_bounds = array<i64: 4, 96>}, {transform_indices = @transform_3, window_bounds = array<i64: 1, 4, 4>}]} {
    %c0 = arith.constant 0 : index
    %c0_0 = arith.constant 0 : index
    %c0_1 = arith.constant 0 : index
    %0 = vector.load %arg1[%c0, %c0_0, %c0_1] : memref<1x4x96xf32, #tpu.memory_space<vmem>>, vector<1x4x96xf32>
    %c0_2 = arith.constant 0 : index
    %c0_3 = arith.constant 0 : index
    %1 = vector.load %arg2[%c0_2, %c0_3] : memref<4x96xf32, #tpu.memory_space<vmem>>, vector<4x96xf32>
    %c0_4 = arith.constant 0 : index
    %c0_5 = arith.constant 0 : index
    %2 = vector.load %arg3[%c0_4, %c0_5] : memref<4x96xf32, #tpu.memory_space<vmem>>, vector<4x96xf32>
    %3 = vector.shape_cast %1 : vector<4x96xf32> to vector<1x4x96xf32>
    %4 = arith.mulf %0, %3 : vector<1x4x96xf32>
    %5 = vector.shape_cast %2 : vector<4x96xf32> to vector<1x4x96xf32>
    %6 = arith.mulf %0, %5 : vector<1x4x96xf32>
    "tpu.trace_start"() <{level = 10 : i32, message = "bip,bjp->bij"}> : () -> ()
    %cst = arith.constant dense<0.000000e+00> : vector<1x4x4xf32>
    %7 = tpu.matmul %4, %6, %cst {dimension_numbers = #tpu.dot_dimension_numbers<[2], [2], [1], [1], [0, 0, 0, 1, 1, 1], [0], [0]>} : vector<1x4x96xf32>, vector<1x4x96xf32>, vector<1x4x4xf32> -> vector<1x4x4xf32>
    "tpu.trace_stop"() : () -> ()
    %8 = tpu.iota {dimensions = array<i32: 0>} : vector<4x4xi32>
    %9 = tpu.iota {dimensions = array<i32: 1>} : vector<4x4xi32>
    %10 = arith.cmpi sgt, %9, %8 : vector<4x4xi32>
    %11 = vector.shape_cast %10 : vector<4x4xi1> to vector<1x4x4xi1>
    %cst_6 = arith.constant 0.000000e+00 : f32
    %12 = vector.broadcast %cst_6 : f32 to vector<1x4x4xf32>
    %13 = arith.select %11, %7, %12 : vector<1x4x4xi1>, vector<1x4x4xf32>
    %14 = arith.mulf %13, %13 : vector<1x4x4xf32>
    %cst_7 = arith.constant dense<0.000000e+00> : vector<1xf32>
    %15 = vector.multi_reduction <add>, %14, %cst_7 [1, 2] : vector<1x4x4xf32> to vector<1xf32>
    %16 = vector.shape_cast %15 : vector<1xf32> to vector<1x1x1xf32>
    %17 = math.rsqrt %16 : vector<1x1x1xf32>
    %18 = vector.broadcast %17 : vector<1x1x1xf32> to vector<1x4x4xf32>
    %19 = arith.mulf %13, %18 : vector<1x4x4xf32>
    %c0_8 = arith.constant 0 : index
    %c0_9 = arith.constant 0 : index
    %c0_10 = arith.constant 0 : index
    %20 = vector.load %arg4[%c0_8, %c0_9, %c0_10] : memref<1x4x4xf32, #tpu.memory_space<vmem>>, vector<1x4x4xf32>
    tpu.vector_store %arg4[%c0_8, %c0_9, %c0_10], %19 {strides = array<i32>} : memref<1x4x4xf32, #tpu.memory_space<vmem>>, vector<1x4x4xf32>,
    return
  }
  func.func @transform_0(%arg0: i32) -> (i32, i32, i32) {
    %c0_i32 = arith.constant 0 : i32
    %c0_i32_0 = arith.constant 0 : i32
    %c0_i32_1 = arith.constant 0 : i32
    return %arg0, %c0_i32, %c0_i32_0 : i32, i32, i32
  }
  func.func @transform_1(%arg0: i32) -> (i32, i32) {
    %c0_i32 = arith.constant 0 : i32
    %c0_i32_0 = arith.constant 0 : i32
    %c0_i32_1 = arith.constant 0 : i32
    return %c0_i32, %c0_i32_0 : i32, i32
  }
  func.func @transform_2(%arg0: i32) -> (i32, i32) {
    %c0_i32 = arith.constant 0 : i32
    %c0_i32_0 = arith.constant 0 : i32
    %c0_i32_1 = arith.constant 0 : i32
    return %c0_i32, %c0_i32_0 : i32, i32
  }
  func.func @transform_3(%arg0: i32) -> (i32, i32, i32) {
    %c0_i32 = arith.constant 0 : i32
    %c0_i32_0 = arith.constant 0 : i32
    %c0_i32_1 = arith.constant 0 : i32
    return %arg0, %c0_i32, %c0_i32_0 : i32, i32, i32
  }
}

</mosaic_0001>

<bundles_post_ra>
// kernel: tile.9
= control target key start
LH: loop header
LB: loop body
LE: loop exit
PB: predicated region body
PF: predicated region fallthrough
CT: control target
= control target key end

     0   :  { %s69_s8 = smov 84   ;;  %s70_s11 = smov 60   ;;  %vm3_vm0 = vcmask 97280   ;;  %vm9_vm1 = vcmask 786080   ;;  %vm15_vm2 = vcmask 687680   ;;  %vm21_vm3 = vcmask 589280   ;;  %s113_s0 = inlined_call_operand.vmem [shape: f32[4,8,12], index: 0, kind: input, shape index: {}]   ;;  %s114_s1 = inlined_call_operand.vmem [shape: f32[4,96], index: 1, kind: output, shape index: {}]  }
   0x1   :  { %v55_v0 = vld [vmem:[%s113_s0 + $0x7] ss:$8 sm:$0xf]   ;;  %v57_v1 = vld [vmem:[%s113_s0 + $0x5] ss:$8 sm:$0xf]  }
   0x2   :  { %7 = vrot.lane.b32.xlu0 %v55_v0, %s69_s8  ;;  %19 = vrot.lane.b32.xlu1 %v57_v1, %s70_s11  ;;  %v56_v2 = vld [vmem:[%s113_s0 + $0x6] ss:$8 sm:$0xf]   ;;  %v58_v3 = vld [vmem:[%s113_s0 + $0x4] ss:$8 sm:$0xf]  }
   0x3   :  { %s71_s16 = smov 72   ;;  %v2_v4 = vld [vmem:[%s113_s0] ss:$8 sm:$0xf]   ;;  %s72_s19 = smov 48   ;;  %vm27_vm4 = vcmask 490880  }
   0x4   :  { %v59_v5 = vld [vmem:[%s113_s0 + $0x3] ss:$8 sm:$0xf]   ;;  %4 = vst.msk [vmem:[#allocation0] sm:$0xf] %vm3_vm0, %v2_v4   ;;  %s73_s24 = smov 36  }
   0x5   :  { %v60_v6 = vld [vmem:[%s113_s0 + $0x2] ss:$8 sm:$0xf]   ;;  %s74_s25 = smov 24   ;;  %vm33_vm5 = vcmask 392480   ;;  %vm39_vm6 = vcmask 294080  }
   0x6   :  { %13 = vrot.lane.b32.xlu0 %v56_v2, %s71_s16  ;;  %25 = vrot.lane.b32.xlu1 %v58_v3, %s72_s19  ;;  %v61_v7 = vld [vmem:[%s113_s0 + $0x1] ss:$8 sm:$0xf]   ;;  %s75_s0 = smov 12   ;;  %vm45_vm7 = vcmask 195680  }
   0xa   :  { %31 = vrot.lane.b32.xlu0 %v59_v5, %s73_s24  ;;  %37 = vrot.lane.b32.xlu1 %v60_v6, %s74_s25 }
   0xe   :  { %43 = vrot.lane.b32.xlu0 %v61_v7, %s75_s0 }
  0x74   :  { %v8_v8 = vpop.permute.xlu0 %7   ;;  %v20_v9 = vpop.permute.xlu1 %19  }
  0x75   :  { %10 = vst.msk [vmem:[#allocation0] sm:$0xf] %vm9_vm1, %v8_v8  }
  0x78   :  { %v14_v10 = vpop.permute.xlu0 %13   ;;  %v26_v11 = vpop.permute.xlu1 %25  }
  0x79   :  { %16 = vst.msk [vmem:[#allocation0] sm:$0xf] %vm15_vm2, %v14_v10  }
  0x7a   :  { %22 = vst.msk [vmem:[#allocation0] sm:$0xf] %vm21_vm3, %v20_v9  }
  0x7b   :  { %28 = vst.msk [vmem:[#allocation0] sm:$0xf] %vm27_vm4, %v26_v11  }
  0x7c   :  { %v32_v12 = vpop.permute.xlu0 %31   ;;  %v38_v13 = vpop.permute.xlu1 %37  }
  0x7d   :  { %34 = vst.msk [vmem:[#allocation0] sm:$0xf] %vm33_vm5, %v32_v12  }
  0x7e   :  { %40 = vst.msk [vmem:[#allocation0] sm:$0xf] %vm39_vm6, %v38_v13  }
  0x80   :  { %v44_v14 = vpop.permute.xlu0 %43  }
  0x81   :  { %46 = vst.msk [vmem:[#allocation0] sm:$0xf] %vm45_vm7, %v44_v14  }
  0x88   :  { %v51_v15 = vld [vmem:[#allocation0] sm:$0xf] }
  0x89   :  { %54 = vst [vmem:[%s114_s1] sm:$0xf] %v51_v15 }

// kernel: spin_decoder_forward.1
= control target key start
LH: loop header
LB: loop body
LE: loop exit
PB: predicated region body
PF: predicated region fallthrough
CT: control target
= control target key end

     0   :  { %s381_s12 = smov 0   ;;  %s413_s0 = inlined_call_operand.vmem [shape: f32[2,4,96], index: 0, kind: input, shape index: {}]   ;;  %s414_s1 = inlined_call_operand.vmem [shape: f32[4,96], index: 1, kind: input, shape index: {}]   ;;  %s415_s2 = inlined_call_operand.vmem [shape: f32[4,96], index: 2, kind: input, shape index: {}]   ;;  %s416_s3 = inlined_call_operand.vmem [shape: f32[2,4,4], index: 3, kind: output, shape index: {}]  }
   0x1 LB: > { %s321_s13 = sadd.s32 4294967295, %s357_s12   ;;  %p325_p0 = scmp.ge.s32.totalorder %s357_s12, 1  ;;  %s357_s12 = sphi %s381_s12, %s13_s12  }
   0x2   : > { %p136_p1 = scmp.lt.s32.totalorder %s357_s12, 3 }
   0x4   : > { %p137_p2 = pnand %p325_p0, %p136_p1 }
   0x5   : > { %p158_p3 = scmp.lt.s32.totalorder (!%p137_p2), %s321_s13, 1 }
   0x6   : > { %140 = sbr.rel (%p137_p2) target bundleno = 384 (0x180), region = 32 }
   0xb   : > { %v359_v0 = vmov 0.0   ;;  %s418_s13 = smov (!%p158_p3, %s321_s13), 1  ;;  %vm360_vm0 = vmmov 0   ;;  %v168_v1 = vld [vmem:[%s415_s2] sm:$0xf]  ;;  %vm171_vm1 = vcmask 785408   ;;  %v248_v6 = vlaneseq }
   0xc   : > { %334 = vmatprep.subr.mxu0 %v359_v0  ;;  %336 = vmatprep.mubr.msk.f32.mxu0 %vm360_vm0, %v359_v0  ;;  %s326_s14 = sshll.u32 %s418_s13, 2  ;;  %v167_v2 = vld [vmem:[%s414_s1] sm:$0xf]  ;;  %vm255_vm3 = vcmask 27648  }
   0xd   : > { %s161_s19 = scalar_lea.vmem %s413_s0, %s326_s14  ;;  %v249_v7 = vshrl.u32 %v248_v6, 7  ;;  %v251_v8 = vand.u32 127, %v248_v6  ;;  %s165_s24 = scalar_lea.vmem %s416_s3, %s326_s14 }
   0xe   : > { %v166_v3 = vld [vmem:[%s161_s19] sm:$0xf] }
   0xf   : > { %v170_v4 = vmul.f32 %v168_v1, %v166_v3  ;;  %v169_v5 = vmul.f32 %v167_v2, %v166_v3  ;;  %vm252_vm2 = vcmp.gt.s32.totalorder %v251_v8, %v249_v7 }
  0x11   : > { %335 = vmatpush3.xpose.msk.msra.mxu0 %vm171_vm1, %v170_v4 }
  0x14   : > { %337 = vmatmul.mubr.msk.f32.vlgmr.msra.gmra.mxu0 %vm171_vm1, %v169_v5 }
  0xd4   : > { %v244_v9 = vpop.f32.mrf.mxu0 }
  0xd5   : > { %v253_v10 = vsel %vm252_vm2, %v244_v9, 0.0 }
  0xd6   : > { %v254_v11 = vmul.f32 %v253_v10, %v253_v10  ;;  %v338_v12 = vpop.f32.mrf.mxu0 }
  0xd8   : > { %v256_v13 = vsel %vm255_vm3, %v254_v11, 0.0 }
  0xd9   : > { %257 = vadd.xlane.f32.xlu0 %v256_v13 }
 0x162   : > { %v258_v14 = vpop.xlane.xlu0 %257 }
 0x163   : > { %v259_v15 = vrot.slane %v258_v14, 4 }
 0x165   : > { %v260_v16 = vadd.f32 %v259_v15, %v258_v14 }
 0x167   : > { %v261_v17 = vrot.slane %v260_v16, 2 }
 0x169   : > { %v262_v18 = vadd.f32 %v261_v17, %v260_v16 }
 0x16b   : > { %v263_v19 = vrot.slane %v262_v18, 1 }
 0x16d   : > { %v264_v20 = vadd.f32 %v263_v19, %v262_v18 }
 0x16f   : > { %349 = vrsqrt.f32 %v264_v20 }
 0x17c   : > { %v350_v21 = vpop.eup %349 }
 0x17d   : > { %v266_v22 = vmul.f32 %v350_v21, %v253_v10 }
 0x17f   : > { %267 = vst.msk [vmem:[%s165_s24] sm:$0xf] %vm255_vm3, %v266_v22 }
 0x180 PF: > { %s13_s12 = sadd.s32 1, %s357_s12  }
 0x181   : > { %p10_p4 = scmp.ge.s32.totalorder %s13_s12, 4  }
 0x183   :  { %12 = sbr.rel (!%p10_p4) target bundleno = 1 (0x1), region = 62 }

</bundles_post_ra>
